<compile_context>
chip_gen: v5e
topology: v5e:2x2
jax: 0.10.0
libtpu: 0.0.40
codegen_flags: <defaults>
</compile_context>

<pallas_src>
import jax
import jax.numpy as jnp
from jax.experimental import pallas as pl
from jax.experimental.pallas import tpu as pltpu


def _swish_kernel(x_ref, o_ref):
    xf = x_ref[...].astype(jnp.float32)
    # swish(x) = x / (1 + exp(-x)); exp lands on the EUP slot, essentially
    # free for a mem-bound elementwise kernel.
    o_ref[...] = (xf / (1.0 + jnp.exp(-xf))).astype(o_ref.dtype)


def swish(x, *, max_tile_bytes=8 * 1024 * 1024):
    """Pallas TPU Swish forward: x * sigmoid(x), any input shape/dtype."""
    orig_shape = x.shape
    dtype = x.dtype
    itemsize = jnp.dtype(dtype).itemsize

    flat = x.reshape(-1)
    total = flat.shape[0]
    if total == 0:
        return x

    # Widest lane width (multiple of 128) that divides the element count so
    # the common case is a zero-copy reshape (no pad, no output slice).
    lane = None
    for cand in (512, 256, 128):
        if total % cand == 0:
            lane = cand
            break
    needs_pad = lane is None
    if needs_pad:
        # Rare path: pad fewer than 128 elements up to a multiple of 128.
        lane = 128
        padded_total = pl.cdiv(total, lane) * lane
        flat = jnp.pad(flat, (0, padded_total - total))
    else:
        padded_total = total

    rows = padded_total // lane
    x2 = flat.reshape(rows, lane)

    # Byte-targeted row tile (~max_tile_bytes per block regardless of dtype),
    # rounded down to the sublane packing quantum (8 f32 / 16 bf16 / 32 int8),
    # and capped at the (sublane-rounded) total row count.
    sub = max(8, 32 // itemsize)
    tm = max(sub, (max_tile_bytes // (lane * itemsize)) // sub * sub)
    tm = min(tm, pl.cdiv(rows, sub) * sub)

    # Partial last row-block is masked by Pallas; no row padding needed.
    grid = (pl.cdiv(rows, tm),)

    tile_bytes = tm * lane * itemsize
    # Double-buffered in + out ~= 4 tiles; add headroom, stay under v7x's
    # 64 MiB physical VMEM per TensorCore.
    vmem_limit = min(48 * 1024 * 1024, max(32 * 1024 * 1024, 5 * tile_bytes))

    out2 = pl.pallas_call(
        _swish_kernel,
        out_shape=jax.ShapeDtypeStruct((rows, lane), dtype),
        grid=grid,
        in_specs=[pl.BlockSpec((tm, lane), lambda i: (i, 0))],
        out_specs=pl.BlockSpec((tm, lane), lambda i: (i, 0)),
        compiler_params=pltpu.CompilerParams(
            # "parallel" lets v7x's two TensorCores split the row tiles;
            # measured no-op on single-TC v5e/v6e.
            # TODO(synk): if a v7x profile shows one TC doing all steps,
            # switch this axis to pltpu.CORE_PARALLEL.
            dimension_semantics=("parallel",),
            vmem_limit_bytes=vmem_limit,
        ),
        cost_estimate=pl.CostEstimate(
            flops=2 * padded_total,
            transcendentals=padded_total,
            bytes_accessed=2 * padded_total * itemsize,
        ),
    )(x2)

    out_flat = out2.reshape(-1)
    if needs_pad:
        out_flat = out_flat[:total]
    return out_flat.reshape(orig_shape)


def swish_ref(x):
    """Pure-JAX reference matching the PyTorch module."""
    return x * jax.nn.sigmoid(x)


if __name__ == "__main__":
    key = jax.random.PRNGKey(0)
    k1, k2, k3, k4 = jax.random.split(key, 4)

    # Primary: small 4-D input (batch=2, channels=4, spatial=16x16),
    # zero-copy path (2048 elements, divisible by 512).
    x = jax.random.normal(k1, (2, 4, 16, 16), dtype=jnp.float32)
    out = jax.block_until_ready(swish(x))
    assert out.shape == x.shape and out.dtype == x.dtype
    assert jnp.allclose(out, swish_ref(x), atol=1e-5, rtol=1e-5)

    # Multi-tile pipelined path: tiny tile forces several grid steps.
    x_mt = jax.random.normal(k2, (2, 32, 16, 16), dtype=jnp.float32)
    out_mt = jax.block_until_ready(swish(x_mt, max_tile_bytes=16 * 1024))
    assert jnp.allclose(out_mt, swish_ref(x_mt), atol=1e-5, rtol=1e-5)

    # bf16 path (sublane quantum 16; f32 math inside the kernel).
    x_bf = jax.random.normal(k3, (2, 4, 16, 16), dtype=jnp.bfloat16)
    out_bf = jax.block_until_ready(swish(x_bf))
    assert out_bf.dtype == jnp.bfloat16
    assert jnp.allclose(out_bf.astype(jnp.float32),
                        swish_ref(x_bf.astype(jnp.float32)),
                        atol=2e-2, rtol=2e-2)

    # Lane-remainder path (105 elements, not a multiple of 128 -> pad+slice).
    x_odd = jax.random.normal(k4, (3, 5, 7), dtype=jnp.float32)
    out_odd = jax.block_until_ready(swish(x_odd))
    assert out_odd.shape == x_odd.shape
    assert jnp.allclose(out_odd, swish_ref(x_odd), atol=1e-5, rtol=1e-5)

    print("KERNEL_OK")
</pallas_src>

<mosaic_0001>
module attributes {stable_mosaic.version = 11 : i64} {
  func.func @_swish_kernel(%arg0: i32, %arg1: memref<8x512xf32, #tpu.memory_space<vmem>>, %arg2: memref<8x512xf32, #tpu.memory_space<vmem>>) attributes {dimension_semantics = [#tpu.dimension_semantics<parallel>], iteration_bounds = array<i64: 1>, scalar_prefetch = 0 : i64, scratch_operands = 0 : i64, tpu.core_type = #tpu.core_type<tc>, window_params = [{transform_indices = @transform_0, window_bounds = array<i64: 8, 512>}, {transform_indices = @transform_1, window_bounds = array<i64: 8, 512>}]} {
    %c0 = arith.constant 0 : index
    %c0_0 = arith.constant 0 : index
    %0 = vector.load %arg1[%c0, %c0_0] : memref<8x512xf32, #tpu.memory_space<vmem>>, vector<8x512xf32>
    %cst = arith.constant 0.000000e+00 : f32
    %1 = vector.broadcast %cst : f32 to vector<8x512xf32>
    %2 = arith.subf %1, %0 : vector<8x512xf32>
    %3 = math.exp %2 : vector<8x512xf32>
    %cst_1 = arith.constant 1.000000e+00 : f32
    %4 = vector.broadcast %cst_1 : f32 to vector<8x512xf32>
    %5 = arith.addf %4, %3 : vector<8x512xf32>
    %6 = arith.divf %0, %5 : vector<8x512xf32>
    %c0_2 = arith.constant 0 : index
    %c0_3 = arith.constant 0 : index
    %7 = vector.load %arg2[%c0_2, %c0_3] : memref<8x512xf32, #tpu.memory_space<vmem>>, vector<8x512xf32>
    tpu.vector_store %arg2[%c0_2, %c0_3], %6 {strides = array<i32>} : memref<8x512xf32, #tpu.memory_space<vmem>>, vector<8x512xf32>,
    return
  }
  func.func @transform_0(%arg0: i32) -> (i32, i32) {
    %c0_i32 = arith.constant 0 : i32
    %c0_i32_0 = arith.constant 0 : i32
    return %arg0, %c0_i32 : i32, i32
  }
  func.func @transform_1(%arg0: i32) -> (i32, i32) {
    %c0_i32 = arith.constant 0 : i32
    %c0_i32_0 = arith.constant 0 : i32
    return %arg0, %c0_i32 : i32, i32
  }
}

</mosaic_0001>

<bundles_post_ra>
// kernel: tpu_custom_call.1
= control target key start
LH: loop header
LB: loop body
LE: loop exit
PB: predicated region body
PF: predicated region fallthrough
CT: control target
= control target key end

     0   :  { %6 = vsyncpa [#allocation3], 0  ;;  %s276_s0 = inlined_call_operand.hbm [shape: f32[4,512], index: 0, kind: input, shape index: {}]   ;;  %s277_s1 = inlined_call_operand.hbm [shape: f32[4,512], index: 1, kind: output, shape index: {}]  }
   0x1   :  { %7 = vsyncpa [#allocation4], 0 }
   0x2   :  { %11 = vsyncadd [#allocation3], 256  ;;  %s12_s8 = sshll.u32 %s276_s0, 4  ;;  %s200_s9 = smov [#allocation2]   ;;  %s13_s8 = int_to_ptr.hbm [resolvable:$true] %s12_s8 }
   0x3   :  { %s14_s10 = sshll.u32 %s200_s9, 4  ;;  %s201_s11 = smov 256   ;;  %s15_s10 = int_to_ptr.vmem [resolvable:$true] %s14_s10 }
   0x4   :  { %s202_s12 = smov 16  }
   0x5   :  { %20 = dma.hbm_to_vmem [thread:$0]  %s13_s8, 256, %s15_s10, [#allocation3], %s201_s11, %s201_s11, %s202_s12  }
   0x6   :  { %196 = dma.done.wait [#allocation3], 512  }
   0x7   :  { %197 = vsyncadd [#allocation3], 4294966784  ;;  %v220_v0 = vld [vmem:[#allocation2] sm:$0xff]  ;;  %v222_v1 = vld [vmem:[#allocation2 + $0x8] sm:$0xff] }
   0x8   :  { %v224_v2 = vld [vmem:[#allocation2 + $0x10] sm:$0xff]  ;;  %v29_v3 = vsub.f32 0.0, %v220_v0  ;;  %v30_v4 = vsub.f32 0.0, %v222_v1  ;;  %v229_v6 = vld [vmem:[#allocation2 + $0x18] sm:$0xff] }
   0x9   :  { %v31_v5 = vsub.f32 0.0, %v224_v2  ;;  %v32_v7 = vsub.f32 0.0, %v229_v6 }
   0xa   :  { %v33_v8 = vmul.f32 1.442695, %v29_v3  ;;  %v35_v9 = vmul.f32 1.442695, %v30_v4 }
   0xb   :  { %v37_v10 = vmul.f32 1.442695, %v31_v5  ;;  %v39_v11 = vmul.f32 1.442695, %v32_v7 }
   0xc   :  { %132 = vpow2.f32 %v33_v8 }
   0xd   :  { %134 = vpow2.f32 %v35_v9 }
   0xe   :  { %136 = vpow2.f32 %v37_v10 }
   0xf   :  { %138 = vpow2.f32 %v39_v11 }
  0x12   :  { %v133_v12 = vpop.eup %132 }
  0x13   :  { %v135_v13 = vpop.eup %134  ;;  %v41_v14 = vadd.f32 1.0, %v133_v12 }
  0x14   :  { %v137_v15 = vpop.eup %136  ;;  %v42_v16 = vadd.f32 1.0, %v135_v13 }
  0x15   :  { %v139_v17 = vpop.eup %138  ;;  %140 = vrcp.f32 %v41_v14  ;;  %v43_v18 = vadd.f32 1.0, %v137_v15  ;;  %v54_v20 = vand.u32 2147483647, %v41_v14  ;;  %v56_v21 = vand.u32 2147483648, %v41_v14 }
  0x16   :  { %142 = vrcp.f32 %v42_v16  ;;  %v44_v19 = vadd.f32 1.0, %v139_v17  ;;  %v69_v23 = vand.u32 2147483647, %v42_v16  ;;  %v71_v24 = vand.u32 2147483648, %v42_v16 }
  0x17   :  { %144 = vrcp.f32 %v43_v18  ;;  %vm50_vm0 = vweird.f32 %v41_v14  ;;  %vm65_vm1 = vweird.f32 %v42_v16  ;;  %vm232_vm3 = vcmp.eq.f32.partialorder %v54_v20, 8.507059e+37 }
  0x18   :  { %146 = vrcp.f32 %v44_v19  ;;  %v57_v30 = vor.u32 1.1754944e-38, %v56_v21  ;;  %vm236_vm5 = vcmp.eq.f32.partialorder %v69_v23, 8.507059e+37  ;;  %v72_v34 = vor.u32 1.1754944e-38, %v71_v24 }
  0x19   :  { %vm80_vm6 = vweird.f32 %v43_v18  ;;  %v84_v38 = vand.u32 2147483647, %v43_v18  ;;  %v86_v41 = vand.u32 2147483648, %v43_v18  ;;  %vm95_vm8 = vweird.f32 %v44_v19 }
  0x1a   :  { %v101_v46 = vand.u32 2147483648, %v44_v19  ;;  %v99_v49 = vand.u32 2147483647, %v44_v19 }
  0x1b   :  { %v141_v22 = vpop.eup %140  ;;  %vm252_vm12 = vcmp.eq.f32.partialorder %v84_v38, 8.507059e+37  ;;  %v87_v55 = vor.u32 1.1754944e-38, %v86_v41 }
  0x1c   :  { %v143_v25 = vpop.eup %142  ;;  %v46_v26 = vmul.f32 %v141_v22, %v41_v14  ;;  %vm51_vm2 = vweird.f32 %v141_v22  ;;  %v102_v60 = vor.u32 1.1754944e-38, %v101_v46  ;;  %vm100_vm15 = vcmp.eq.f32.partialorder %v99_v49, 8.507059e+37 }
  0x1d   :  { %v61_v27 = vmul.f32 %v143_v25, %v42_v16  ;;  %v145_v31 = vpop.eup %144  ;;  %vm66_vm4 = vweird.f32 %v143_v25  ;;  %vm241_vm7 = vmor %vm50_vm0, %vm51_vm2 }
  0x1e   :  { %v47_v28 = vsub.f32 1.0, %v46_v26  ;;  %v147_v35 = vpop.eup %146  ;;  %v76_v37 = vmul.f32 %v145_v31, %v43_v18  ;;  %vm246_vm9 = vmor %vm65_vm1, %vm66_vm4  ;;  %vm81_vm10 = vweird.f32 %v145_v31 }
  0x1f   :  { %v62_v32 = vsub.f32 1.0, %v61_v27  ;;  %v91_v42 = vmul.f32 %v147_v35, %v44_v19  ;;  %vm96_vm11 = vweird.f32 %v147_v35  ;;  %vm82_vm13 = vmor %vm80_vm6, %vm81_vm10 }
  0x20   :  { %v48_v36 = vmul.f32 %v141_v22, %v47_v28  ;;  %v77_v45 = vsub.f32 1.0, %v76_v37  ;;  %vm97_vm14 = vmor %vm95_vm8, %vm96_vm11 }
  0x21   :  { %v63_v40 = vmul.f32 %v143_v25, %v62_v32  ;;  %v92_v48 = vsub.f32 1.0, %v91_v42 }
  0x22   :  { %v49_v43 = vadd.f32 %v141_v22, %v48_v36  ;;  %v78_v51 = vmul.f32 %v145_v31, %v77_v45 }
  0x23   :  { %v64_v47 = vadd.f32 %v143_v25, %v63_v40  ;;  %v93_v56 = vmul.f32 %v147_v35, %v92_v48 }
  0x24   :  { %v53_v50 = vsel %vm241_vm7, %v141_v22, %v49_v43  ;;  %v79_v59 = vadd.f32 %v145_v31, %v78_v51 }
  0x25   :  { %v58_v53 = vsel %vm232_vm3, %v57_v30, %v53_v50  ;;  %v68_v54 = vsel %vm246_vm9, %v143_v25, %v64_v47  ;;  %v94_v62 = vadd.f32 %v147_v35, %v93_v56 }
  0x26   :  { %v59_v57 = vmul.f32 %v58_v53, %v220_v0  ;;  %v73_v58 = vsel %vm236_vm5, %v72_v34, %v68_v54  ;;  %v83_v63 = vsel %vm82_vm13, %v145_v31, %v79_v59 }
  0x27   :  { %v74_v61 = vmul.f32 %v73_v58, %v222_v1  ;;  %v88_v3 = vsel %vm252_vm12, %v87_v55, %v83_v63  ;;  %v98_v4 = vsel %vm97_vm14, %v147_v35, %v94_v62 }
  0x28   :  { %105 = vst [vmem:[#allocation5] sm:$0xff] %v59_v57  ;;  %v89_v0 = vmul.f32 %v88_v3, %v224_v2  ;;  %v103_v5 = vsel %vm100_vm15, %v102_v60, %v98_v4 }
  0x29   :  { %106 = vst [vmem:[#allocation5 + $0x8] sm:$0xff] %v74_v61  ;;  %v104_v7 = vmul.f32 %v103_v5, %v229_v6 }
  0x2a   :  { %107 = vst [vmem:[#allocation5 + $0x10] sm:$0xff] %v89_v0 }
  0x2b   :  { %108 = vst [vmem:[#allocation5 + $0x18] sm:$0xff] %v104_v7 }
  0x2c   :  { %112 = vsyncadd [#allocation4], 256  ;;  %s115_s14 = sshll.u32 %s277_s1, 4  ;;  %s203_s15 = smov [#allocation5]   ;;  %s116_s14 = int_to_ptr.hbm [resolvable:$true] %s115_s14 }
  0x2d   :  { %s113_s16 = sshll.u32 %s203_s15, 4  ;;  %s114_s16 = int_to_ptr.vmem [resolvable:$true] %s113_s16 }
  0x2e   :  { %121 = dma.vmem_to_hbm [thread:$0]  %s114_s16, 256, %s116_s14, [#allocation4], %s201_s11, %s201_s11, %s202_s12  }
  0x2f   :  { %198 = dma.done.wait [#allocation4], 512  }
  0x30   :  { %199 = vsyncadd [#allocation4], 4294966784 }
  0x31   :  { %126 = vsyncpa [#allocation3], 1 }
  0x32   :  { %127 = vsyncpa [#allocation4], 1 }

</bundles_post_ra>
